<compile_context>
chip_gen: v7x
topology: tpu7x:2x2x1
jax: 0.10.0
libtpu: 0.0.40
codegen_flags: <defaults>
</compile_context>

<pallas_src>
import functools

import jax
import jax.numpy as jnp
from jax.experimental import pallas as pl
from jax.experimental.pallas import tpu as pltpu

IGNORE_INDEX = -100

# Raised scoped-VMEM limit: above v5e's 16 MiB default, at v6e/v7x defaults,
# and well under v7x's 64 MiB physical VMEM per TensorCore.
_VMEM_LIMIT_BYTES = 32 * 1024 * 1024
# Budget used when auto-sizing the row tile (leaves headroom under the limit
# for double-buffered inputs plus in-kernel f32 temporaries).
_VMEM_TILE_BUDGET = 20 * 1024 * 1024


def _round_up(x, m):
    return ((x + m - 1) // m) * m


def _pick_block_rows(n_rows, n_classes, logits_itemsize):
    """Largest row tile (multiple of 128, <=1024) that fits the VMEM budget."""
    # Per row: double-buffered logits DMA tile + ~3 live (rows, C) f32 temps
    # (upcast x, exp, masked-select) + tiny target/weight/output buffers.
    per_row = (2 * n_classes * logits_itemsize        # pipelined logits buffers
               + 3 * n_classes * 4                     # in-kernel f32 temporaries
               + 2 * (4 + 4 + 4))                      # targets / w_t / out buffers
    br = _VMEM_TILE_BUDGET // per_row
    br = max(128, min(1024, (br // 128) * 128))
    # Don't tile past the (row-padded) problem size.
    br = min(br, _round_up(n_rows, 128))
    return int(br)


def _ce_kernel(x_ref, t_ref, wt_ref, o_ref):
    """Per-row cross entropy.

    x_ref:  (TN, C) logits tile (caller dtype; upcast to f32 here)
    t_ref:  (TN, 1) int32 targets tile
    wt_ref: (TN, 1) f32 per-row class weight, already 0 where target == ignore
    o_ref:  (1, TN) per-row loss (lane-dense output row)
    """
    x = x_ref[...].astype(jnp.float32)          # (TN, C)
    t = t_ref[...]                               # (TN, 1) int32
    w_t = wt_ref[...]                            # (TN, 1) f32

    tn, c = x.shape

    # Numerically-stable log-sum-exp over the class (lane) axis.
    # (If C is not a multiple of 128 the block is lane-padded; Mosaic masks the
    #  padded lanes of full-dim blocks in these reductions.)
    m = jnp.max(x, axis=-1, keepdims=True)                       # (TN, 1)
    lse = m + jnp.log(jnp.sum(jnp.exp(x - m), axis=-1, keepdims=True))

    # Gather the target logit via masked select + lane reduction
    # (no i1->f32 convert, no (TN, C) one-hot multiply).
    cidx = jax.lax.broadcasted_iota(jnp.int32, (tn, c), 1)        # (TN, C)
    picked = jnp.sum(jnp.where(cidx == t, x, 0.0),
                     axis=-1, keepdims=True)                      # (TN, 1)

    # loss_i = -w[y_i] * log_softmax(x)[i, y_i]; 0 where target == ignore_index.
    loss = w_t * (lse - picked)
    loss = jnp.where(t == IGNORE_INDEX, 0.0, loss)                # belt-and-braces

    # Lane-dense store: (TN, 1) column -> (1, TN) row (cheap XLU transpose)
    # so the writeback is an unmasked, contiguous DMA each grid step.
    o_ref[...] = jnp.transpose(loss).astype(o_ref.dtype)


@functools.partial(jax.jit, static_argnames=("block_rows",))
def cross_entropy_loss(x, target, class_weights=None, *, block_rows=None):
    """reduction='none' cross entropy: returns per-sample loss of shape (N,)."""
    n, c = x.shape
    if block_rows is None:
        block_rows = _pick_block_rows(n, c, jnp.dtype(x.dtype).itemsize)
    # TODO(synk): for vocabulary-scale C, add a class-axis grid dim with online
    # (flash-style) max/sum accumulators instead of one tile over the full row.

    target = target.astype(jnp.int32)
    valid = target != IGNORE_INDEX
    safe_t = jnp.where(valid, target, 0)
    # Hoisted class-weight gather: per-row weight, zeroed for ignored rows.
    if class_weights is None:
        w_t = valid.astype(jnp.float32)
    else:
        w_t = jnp.where(valid, class_weights.astype(jnp.float32)[safe_t], 0.0)

    # Pad rows to a tile multiple; padded rows use ignore_index -> zero loss.
    pad_n = _round_up(n, block_rows)
    pad = pad_n - n
    if pad:
        x = jnp.pad(x, ((0, pad), (0, 0)))
        target = jnp.pad(target, (0, pad), constant_values=IGNORE_INDEX)
        w_t = jnp.pad(w_t, (0, pad))

    t2d = target.reshape(pad_n, 1)
    wt2d = w_t.reshape(pad_n, 1)
    num_blocks = pad_n // block_rows

    out = pl.pallas_call(
        _ce_kernel,
        out_shape=jax.ShapeDtypeStruct((1, pad_n), jnp.float32),
        grid_spec=pltpu.PrefetchScalarGridSpec(
            num_scalar_prefetch=0,
            grid=(num_blocks,),
            in_specs=[
                pl.BlockSpec((block_rows, c), lambda i: (i, 0)),   # logits tile
                pl.BlockSpec((block_rows, 1), lambda i: (i, 0)),   # targets tile
                pl.BlockSpec((block_rows, 1), lambda i: (i, 0)),   # per-row weights
            ],
            out_specs=pl.BlockSpec((1, block_rows), lambda i: (0, i)),
        ),
        compiler_params=pltpu.CompilerParams(
            dimension_semantics=("parallel",),
            vmem_limit_bytes=_VMEM_LIMIT_BYTES,
        ),
    )(x, t2d, wt2d)
    return out.reshape(pad_n)[:n]


def _reference(x, target, class_weights=None):
    """Pure-JAX reference matching torch.nn.CrossEntropyLoss(reduction='none')."""
    x = x.astype(jnp.float32)
    n, c = x.shape
    if class_weights is None:
        class_weights = jnp.ones((c,), dtype=jnp.float32)
    logz = jax.nn.logsumexp(x, axis=-1)
    safe_t = jnp.where(target == IGNORE_INDEX, 0, target)
    picked = jnp.take_along_axis(x, safe_t[:, None], axis=-1)[:, 0]
    w_t = class_weights[safe_t]
    loss = w_t * (logz - picked)
    return jnp.where(target == IGNORE_INDEX, 0.0, loss)


if __name__ == "__main__":
    key = jax.random.PRNGKey(0)
    k_x, k_t, k_w, k_x2, k_t2 = jax.random.split(key, 5)

    # Test 1: weighted, with ignore_index entries.
    N, C = 128, 256
    x = jax.random.normal(k_x, (N, C), dtype=jnp.float32)
    target = jax.random.randint(k_t, (N,), 0, C, dtype=jnp.int32)
    target = target.at[::7].set(IGNORE_INDEX)
    class_weights = 0.5 + jax.random.uniform(k_w, (C,), dtype=jnp.float32)

    loss = jax.block_until_ready(cross_entropy_loss(x, target, class_weights))
    ref = _reference(x, target, class_weights)
    assert loss.shape == (N,)
    assert jnp.allclose(loss, ref, atol=1e-4, rtol=1e-4), (
        f"max abs err {jnp.max(jnp.abs(loss - ref))}")

    # Test 2: unweighted, N not a multiple of the tile (exercises row padding).
    N2 = 100
    x2 = jax.random.normal(k_x2, (N2, C), dtype=jnp.float32)
    target2 = jax.random.randint(k_t2, (N2,), 0, C, dtype=jnp.int32)
    target2 = target2.at[::9].set(IGNORE_INDEX)

    loss2 = jax.block_until_ready(cross_entropy_loss(x2, target2))
    ref2 = _reference(x2, target2)
    assert loss2.shape == (N2,)
    assert jnp.allclose(loss2, ref2, atol=1e-4, rtol=1e-4), (
        f"max abs err {jnp.max(jnp.abs(loss2 - ref2))}")

    print("KERNEL_OK")
</pallas_src>

<mosaic_0001>
module attributes {stable_mosaic.version = 11 : i64} {
  func.func @_ce_kernel(%arg0: i32, %arg1: memref<128x256xf32, #tpu.memory_space<vmem>>, %arg2: memref<128x1xi32, #tpu.memory_space<vmem>>, %arg3: memref<128x1xf32, #tpu.memory_space<vmem>>, %arg4: memref<1x128xf32, #tpu.memory_space<vmem>>) attributes {dimension_semantics = [#tpu.dimension_semantics<parallel>], iteration_bounds = array<i64: 1>, scalar_prefetch = 0 : i64, scratch_operands = 0 : i64, tpu.core_type = #tpu.core_type<tc>, window_params = [{transform_indices = @transform_0, window_bounds = array<i64: 128, 256>}, {transform_indices = @transform_1, window_bounds = array<i64: 128, 1>}, {transform_indices = @transform_2, window_bounds = array<i64: 128, 1>}, {transform_indices = @transform_3, window_bounds = array<i64: 1, 128>}]} {
    %c0 = arith.constant 0 : index
    %c0_0 = arith.constant 0 : index
    %0 = vector.load %arg1[%c0, %c0_0] : memref<128x256xf32, #tpu.memory_space<vmem>>, vector<128x256xf32>
    %c0_1 = arith.constant 0 : index
    %c0_2 = arith.constant 0 : index
    %1 = vector.load %arg2[%c0_1, %c0_2] : memref<128x1xi32, #tpu.memory_space<vmem>>, vector<128x1xi32>
    %c0_3 = arith.constant 0 : index
    %c0_4 = arith.constant 0 : index
    %2 = vector.load %arg3[%c0_3, %c0_4] : memref<128x1xf32, #tpu.memory_space<vmem>>, vector<128x1xf32>
    %cst = arith.constant dense<0xFF800000> : vector<128xf32>
    %3 = vector.multi_reduction <maximumf>, %0, %cst [1] : vector<128x256xf32> to vector<128xf32>
    %4 = vector.shape_cast %3 : vector<128xf32> to vector<128x1xf32>
    %5 = vector.broadcast %4 : vector<128x1xf32> to vector<128x256xf32>
    %6 = arith.subf %0, %5 : vector<128x256xf32>
    %7 = math.exp %6 : vector<128x256xf32>
    %cst_5 = arith.constant dense<0.000000e+00> : vector<128xf32>
    %8 = vector.multi_reduction <add>, %7, %cst_5 [1] : vector<128x256xf32> to vector<128xf32>
    %9 = vector.shape_cast %8 : vector<128xf32> to vector<128x1xf32>
    %10 = math.log %9 : vector<128x1xf32>
    %11 = arith.addf %4, %10 : vector<128x1xf32>
    %12 = tpu.iota {dimensions = array<i32: 1>} : vector<128x256xi32>
    %13 = vector.broadcast %1 : vector<128x1xi32> to vector<128x256xi32>
    %14 = arith.cmpi eq, %12, %13 : vector<128x256xi32>
    %cst_6 = arith.constant 0.000000e+00 : f32
    %15 = vector.broadcast %cst_6 : f32 to vector<128x256xf32>
    %16 = arith.select %14, %0, %15 : vector<128x256xi1>, vector<128x256xf32>
    %cst_7 = arith.constant dense<0.000000e+00> : vector<128xf32>
    %17 = vector.multi_reduction <add>, %16, %cst_7 [1] : vector<128x256xf32> to vector<128xf32>
    %18 = vector.shape_cast %17 : vector<128xf32> to vector<128x1xf32>
    %19 = arith.subf %11, %18 : vector<128x1xf32>
    %20 = arith.mulf %2, %19 : vector<128x1xf32>
    %c-100_i32 = arith.constant -100 : i32
    %21 = vector.broadcast %c-100_i32 : i32 to vector<128x1xi32>
    %22 = arith.cmpi eq, %1, %21 : vector<128x1xi32>
    %cst_8 = arith.constant 0.000000e+00 : f32
    %23 = vector.broadcast %cst_8 : f32 to vector<128x1xf32>
    %24 = arith.select %22, %23, %20 : vector<128x1xi1>, vector<128x1xf32>
    %25 = tpu.transpose %24, [1, 0] : vector<128x1xf32> -> vector<1x128xf32>
    %c0_9 = arith.constant 0 : index
    %c0_10 = arith.constant 0 : index
    %26 = vector.load %arg4[%c0_9, %c0_10] : memref<1x128xf32, #tpu.memory_space<vmem>>, vector<1x128xf32>
    tpu.vector_store %arg4[%c0_9, %c0_10], %25 {strides = array<i32>} : memref<1x128xf32, #tpu.memory_space<vmem>>, vector<1x128xf32>,
    return
  }
  func.func @transform_0(%arg0: i32) -> (i32, i32) {
    %c0_i32 = arith.constant 0 : i32
    %c0_i32_0 = arith.constant 0 : i32
    return %arg0, %c0_i32 : i32, i32
  }
  func.func @transform_1(%arg0: i32) -> (i32, i32) {
    %c0_i32 = arith.constant 0 : i32
    %c0_i32_0 = arith.constant 0 : i32
    return %arg0, %c0_i32 : i32, i32
  }
  func.func @transform_2(%arg0: i32) -> (i32, i32) {
    %c0_i32 = arith.constant 0 : i32
    %c0_i32_0 = arith.constant 0 : i32
    return %arg0, %c0_i32 : i32, i32
  }
  func.func @transform_3(%arg0: i32) -> (i32, i32) {
    %c0_i32 = arith.constant 0 : i32
    %c0_i32_0 = arith.constant 0 : i32
    return %c0_i32, %arg0 : i32, i32
  }
}

</mosaic_0001>

<bundles_post_ra>
// kernel: cross_entropy_loss.1
= control target key start
LH: loop header
LB: loop body
LE: loop exit
PB: predicated region body
PF: predicated region fallthrough
CT: control target
= control target key end

     0   :  { %v717_v7 = vmov 0   ;;  %s1308_s0 = inlined_call_operand.vmem [shape: f32[128,256], index: 0, kind: input, shape index: {}]   ;;  %s1309_s1 = inlined_call_operand.vmem [shape: s32[128,1], index: 1, kind: input, shape index: {}]   ;;  %s1310_s2 = inlined_call_operand.vmem [shape: f32[128,1], index: 2, kind: input, shape index: {}]   ;;  %s1311_s3 = inlined_call_operand.hbm [shape: f32[1,128], index: 3, kind: output, shape index: {}]  }
   0x1   :  { %v742_v0 = vld [vmem:[%s1308_s0 + $0x20] sm:$0xff]  ;;  %v747_v1 = vld [vmem:[%s1308_s0 + $0x28] sm:$0xff]  ;;  %v764_v5 = vld [vmem:[%s1308_s0 + $0x30] sm:$0xff]  ;;  %595 = vset.pattern.permute.xlu1 %v717_v7  ;;  %596 = vset.pattern.permute.xlu0 %v717_v7 }
   0x2   :  { %v752_v2 = vld [vmem:[%s1308_s0] sm:$0xff]  ;;  %v85_v3 = vmax.f32 %v742_v0, %v747_v1  ;;  %v759_v4 = vld [vmem:[%s1308_s0 + $0x8] sm:$0xff]  ;;  %v769_v6 = vld [vmem:[%s1308_s0 + $0x38] sm:$0xff] }
   0x3   :  { %v79_v8 = vmax.f32 %v752_v2, %v759_v4  ;;  %v776_v9 = vld [vmem:[%s1308_s0 + $0x10] sm:$0xff]  ;;  %v781_v10 = vld [vmem:[%s1308_s0 + $0x18] sm:$0xff]  ;;  %v88_v11 = vmax.f32 %v764_v5, %v769_v6  ;;  %v800_v15 = vld [vmem:[%s1308_s0 + $0x40] sm:$0xff] }
   0x4   :  { %86 = vmax.xlane.f32.xlu1 %v85_v3  ;;  %v82_v12 = vmax.f32 %v776_v9, %v781_v10  ;;  %v790_v13 = vld [vmem:[%s1308_s0 + $0x50] sm:$0xff]  ;;  %v795_v14 = vld [vmem:[%s1308_s0 + $0x58] sm:$0xff]  ;;  %v805_v16 = vld [vmem:[%s1308_s0 + $0x48] sm:$0xff] }
   0x5   :  { %80 = vmax.xlane.f32.xlu0 %v79_v8  ;;  %v94_v17 = vmax.f32 %v790_v13, %v795_v14  ;;  %v91_v18 = vmax.f32 %v800_v15, %v805_v16  ;;  %v814_v19 = vld [vmem:[%s1308_s0 + $0x70] sm:$0xff]  ;;  %v819_v20 = vld [vmem:[%s1308_s0 + $0x78] sm:$0xff]  ;;  %v824_v21 = vld [vmem:[%s1308_s0 + $0x60] sm:$0xff] }
   0x6   :  { %v829_v22 = vld [vmem:[%s1308_s0 + $0x68] sm:$0xff]  ;;  %v100_v23 = vmax.f32 %v814_v19, %v819_v20  ;;  %v838_v25 = vld [vmem:[%s1308_s0 + $0x90] sm:$0xff]  ;;  %v843_v26 = vld [vmem:[%s1308_s0 + $0x98] sm:$0xff] }
   0x7   :  { %v97_v24 = vmax.f32 %v824_v21, %v829_v22  ;;  %v848_v27 = vld [vmem:[%s1308_s0 + $0x80] sm:$0xff]  ;;  %v853_v28 = vld [vmem:[%s1308_s0 + $0x88] sm:$0xff]  ;;  %v106_v29 = vmax.f32 %v838_v25, %v843_v26  ;;  %v862_v31 = vld [vmem:[%s1308_s0 + $0xb0] sm:$0xff] }
   0x8   :  { %89 = vmax.xlane.f32.xlu1 %v88_v11  ;;  %v103_v30 = vmax.f32 %v848_v27, %v853_v28  ;;  %v867_v32 = vld [vmem:[%s1308_s0 + $0xb8] sm:$0xff] }
   0x9   :  { %83 = vmax.xlane.f32.xlu0 %v82_v12 }
   0xc   :  { %95 = vmax.xlane.f32.xlu1 %v94_v17 }
   0xd   :  { %92 = vmax.xlane.f32.xlu0 %v91_v18 }
  0x10   :  { %101 = vmax.xlane.f32.xlu1 %v100_v23 }
  0x11   :  { %98 = vmax.xlane.f32.xlu0 %v97_v24 }
  0x12   :  { %8 = vsyncpa [#allocation3], 0  ;;  %v872_v33 = vld [vmem:[%s1308_s0 + $0xa0] sm:$0xff]  ;;  %v877_v34 = vld [vmem:[%s1308_s0 + $0xa8] sm:$0xff]  ;;  %v112_v35 = vmax.f32 %v862_v31, %v867_v32  ;;  %s718_s27 = smov [#allocation2]  }
  0x13   :  { %v109_v36 = vmax.f32 %v872_v33, %v877_v34  ;;  %v886_v37 = vld [vmem:[%s1308_s0 + $0xd0] sm:$0xff]  ;;  %v891_v38 = vld [vmem:[%s1308_s0 + $0xd8] sm:$0xff]  ;;  %v896_v39 = vld [vmem:[%s1308_s0 + $0xc0] sm:$0xff]  ;;  %s585_s28 = sshll.u32 %s718_s27, 4  ;;  %s586_s28 = int_to_ptr.vmem [resolvable:$true] %s585_s28 }
  0x14   :  { %107 = vmax.xlane.f32.xlu1 %v106_v29  ;;  %v901_v40 = vld [vmem:[%s1308_s0 + $0xc8] sm:$0xff]  ;;  %v118_v41 = vmax.f32 %v886_v37, %v891_v38  ;;  %v910_v43 = vld [vmem:[%s1308_s0 + $0xf0] sm:$0xff]  ;;  %v915_v44 = vld [vmem:[%s1308_s0 + $0xf8] sm:$0xff]  ;;  %s693_s29 = scalar_lea.vmem %s586_s28, 16  ;;  %s697_s30 = scalar_lea.vmem %s586_s28, 32 }
  0x15   :  { %104 = vmax.xlane.f32.xlu0 %v103_v30  ;;  %v115_v42 = vmax.f32 %v896_v39, %v901_v40  ;;  %v920_v45 = vld [vmem:[%s1308_s0 + $0xe0] sm:$0xff]  ;;  %v925_v46 = vld [vmem:[%s1308_s0 + $0xe8] sm:$0xff]  ;;  %v124_v47 = vmax.f32 %v910_v43, %v915_v44  ;;  %v940_v50 = vld [vmem:[%s1309_s1 + $0x10] sm:$0xff]  ;;  %p694_p0 = scmp.ne.s32.totalorder %s586_s28, %s693_s29  ;;  %p698_p1 = scmp.lt.s32.totalorder %s586_s28, %s586_s28 }
  0x16   :  { %v121_v48 = vmax.f32 %v920_v45, %v925_v46  ;;  %v934_v49 = vld [vmem:[%s1309_s1] sm:$0xff]  ;;  %v945_v51 = vld [vmem:[%s1309_s1 + $0x8] sm:$0xff]  ;;  %v951_v52 = vld [vmem:[%s1309_s1 + $0x18] sm:$0xff]  ;;  %p699_p2 = scmp.lt.s32.totalorder %s697_s30, %s693_s29 }
  0x17   :  { %v957_v53 = vld [vmem:[%s1309_s1 + $0x50] sm:$0xff]  ;;  %v963_v54 = vld [vmem:[%s1309_s1 + $0x20] sm:$0xff]  ;;  %v975_v56 = vld [vmem:[%s1309_s1 + $0x28] sm:$0xff] }
  0x18   :  { %113 = vmax.xlane.f32.xlu1 %v112_v35  ;;  %1333 = vst [vmem:[#allocation5_spill] sm:$0xff] %v957_v53  ;;  %1334 = vst [vmem:[#allocation6_spill] sm:$0xff] %v963_v54  ;;  %v969_v55 = vld [vmem:[%s1309_s1 + $0x60] sm:$0xff]  ;;  %v981_v57 = vld [vmem:[%s1309_s1 + $0x70] sm:$0xff]  ;;  %p700_p3 = por %p699_p2, %p698_p1 }
  0x19   :  { %110 = vmax.xlane.f32.xlu0 %v109_v36  ;;  %1335 = vst [vmem:[#allocation7_spill] sm:$0xff] %v969_v55  ;;  %1336 = vst [vmem:[#allocation8_spill] sm:$0xff] %v975_v56  ;;  %v987_v58 = vld [vmem:[%s1309_s1 + $0x30] sm:$0xff]  ;;  %v994_v59 = vld [vmem:[%s1309_s1 + $0x38] sm:$0xff] }
  0x1a   :  { %1337 = vst [vmem:[#allocation9_spill] sm:$0xff] %v981_v57  ;;  %1338 = vst [vmem:[#allocation10_spill] sm:$0xff] %v987_v58  ;;  %v1000_v60 = vld [vmem:[%s1309_s1 + $0x40] sm:$0xff]  ;;  %v1006_v61 = vld [vmem:[%s1309_s1 + $0x48] sm:$0xff]  ;;  %p701_p4 = pnand %p700_p3, %p694_p0 }
  0x1b   :  { %1339 = vst [vmem:[#allocation11_spill] sm:$0xff] %v994_v59  ;;  %1340 = vst [vmem:[#allocation12_spill] sm:$0xff] %v1000_v60  ;;  %v1012_v62 = vld [vmem:[%s1309_s1 + $0x58] sm:$0xff]  ;;  %v1018_v63 = vld [vmem:[%s1309_s1 + $0x68] sm:$0xff] }
  0x1c   :  { %119 = vmax.xlane.f32.xlu1 %v118_v41  ;;  %1341 = vst [vmem:[#allocation13_spill] sm:$0xff] %v1006_v61  ;;  %1342 = vst [vmem:[#allocation14_spill] sm:$0xff] %v1012_v62  ;;  %v1024_v3 = vld [vmem:[%s1309_s1 + $0x78] sm:$0xff] }
  0x1d   :  { %116 = vmax.xlane.f32.xlu0 %v115_v42  ;;  %1343 = vst [vmem:[#allocation15_spill] sm:$0xff] %v1018_v63  ;;  %1344 = vst [vmem:[#allocation16_spill] sm:$0xff] %v1024_v3 }
  0x20   :  { %125 = vmax.xlane.f32.xlu1 %v124_v47 }
  0x21   :  { %122 = vmax.xlane.f32.xlu0 %v121_v48 }
  0x31   :  { %323 = vperm.xlu1 %595, %v934_v49  }
  0x35   :  { %329 = vperm.xlu1 %595, %v940_v50  }
  0x37   :  { %326 = vperm.xlu0 %596, %v945_v51  }
  0x39   :  { %332 = vperm.xlu1 %595, %v951_v52  }
  0x3b   :  { %353 = vperm.xlu0 %596, %v957_v53  }
  0x3d   :  { %335 = vperm.xlu1 %595, %v963_v54  }
  0x3f   :  { %359 = vperm.xlu0 %596, %v969_v55  }
  0x41   :  { %338 = vperm.xlu1 %595, %v975_v56  }
  0x43   :  { %365 = vperm.xlu0 %596, %v981_v57  }
  0x45   :  { %341 = vperm.xlu1 %595, %v987_v58  }
  0x49   :  { %344 = vperm.xlu1 %595, %v994_v59  }
  0x4d   :  { %347 = vperm.xlu1 %595, %v1000_v60   ;;  %v319_v60 = vlaneseq }
  0x51   :  { %350 = vperm.xlu1 %595, %v1006_v61  }
  0x55   :  { %356 = vperm.xlu1 %595, %v1012_v62  }
  0x59   :  { %362 = vperm.xlu1 %595, %v1018_v63  }
  0x5d   :  { %368 = vperm.xlu1 %595, %v1024_v3  }
  0x91   :  { %v1027_v7 = vpop.xlane.xlu1 %86 }
  0x92   :  { %v131_v8 = vsub.f32 %v742_v0, %v1027_v7  ;;  %v132_v11 = vsub.f32 %v747_v1, %v1027_v7  ;;  %v1033_v12 = vpop.xlane.xlu0 %80 }
  0x94   :  { %v167_v17 = vmul.f32 1.442695, %v131_v8  ;;  %v169_v18 = vmul.f32 1.442695, %v132_v11 }
  0x95   :  { %v1035_v23 = vpop.xlane.xlu1 %89 }
  0x96   :  { %597 = vpow2.f32 %v167_v17  ;;  %v1037_v24 = vpop.xlane.xlu0 %83 }
  0x97   :  { %599 = vpow2.f32 %v169_v18 }
  0x99   :  { %v1039_v29 = vpop.xlane.xlu1 %95 }
  0x9a   :  { %1345 = vst [vmem:[#allocation17_spill] sm:$0xff] %v1039_v29  ;;  %v137_v30 = vsub.f32 %v790_v13, %v1039_v29  ;;  %v138_v35 = vsub.f32 %v795_v14, %v1039_v29  ;;  %v1045_v36 = vpop.xlane.xlu0 %92 }
  0x9c   :  { %v179_v41 = vmul.f32 1.442695, %v137_v30  ;;  %v181_v42 = vmul.f32 1.442695, %v138_v35 }
  0x9d   :  { %v1047_v47 = vpop.xlane.xlu1 %101 }
  0x9e   :  { %1346 = vst [vmem:[#allocation18_spill] sm:$0xff] %v1047_v47  ;;  %601 = vpow2.f32 %v179_v41  ;;  %v141_v48 = vsub.f32 %v814_v19, %v1047_v47  ;;  %v142_v8 = vsub.f32 %v819_v20, %v1047_v47  ;;  %v1053_v11 = vpop.xlane.xlu0 %98 }
  0x9f   :  { %603 = vpow2.f32 %v181_v42 }
  0xa0   :  { %v598_v17 = vpop.eup %597  ;;  %v187_v18 = vmul.f32 1.442695, %v141_v48  ;;  %v189_v3 = vmul.f32 1.442695, %v142_v8 }
  0xa1   :  { %v600_v57 = vpop.eup %599  ;;  %v1055_v63 = vpop.xlane.xlu1 %107 }
  0xa2   :  { %1347 = vst [vmem:[#allocation19_spill] sm:$0xff] %v1055_v63  ;;  %605 = vpow2.f32 %v187_v18  ;;  %v145_v30 = vsub.f32 %v838_v25, %v1055_v63  ;;  %v1059_v35 = vpop.xlane.xlu0 %104  ;;  %v229_v41 = vadd.f32 %v600_v57, %v598_v17  ;;  %v146_v55 = vsub.f32 %v843_v26, %v1055_v63 }
  0xa3   :  { %1348 = vst [vmem:[#allocation20_spill] sm:$0xff] %v1059_v35  ;;  %607 = vpow2.f32 %v189_v3  ;;  %v143_v42 = vsub.f32 %v848_v27, %v1059_v35  ;;  %v144_v48 = vsub.f32 %v853_v28, %v1059_v35  ;;  %v1081_v35 = vand.u32 127, %v319_v60 }
  0xa4   :  { %230 = vadd.xlane.f32.xlu1 %v229_v41  ;;  %v195_v53 = vmul.f32 1.442695, %v145_v30  ;;  %v197_v57 = vmul.f32 1.442695, %v146_v55 }
  0xa5   :  { %v191_v8 = vmul.f32 1.442695, %v143_v42  ;;  %v193_v62 = vmul.f32 1.442695, %v144_v48  ;;  %v1067_v18 = vpop.xlane.xlu1 %113  ;;  %v1092_v60 = vadd.s32 128, %v1081_v35 }
  0xa6   :  { %1349 = vst [vmem:[#allocation21_spill] sm:$0xff] %v1067_v18  ;;  %v1069_v61 = vpop.xlane.xlu0 %110  ;;  %v149_v41 = vsub.f32 %v862_v31, %v1067_v18 }
  0xa7   :  { %1350 = vst [vmem:[#allocation22_spill] sm:$0xff] %v1069_v61  ;;  %v147_v3 = vsub.f32 %v872_v33, %v1069_v61  ;;  %v148_v17 = vsub.f32 %v877_v34, %v1069_v61  ;;  %609 = vpow2.f32 %v191_v8  ;;  %v150_v61 = vsub.f32 %v867_v32, %v1067_v18 }
  0xa8   :  { %v602_v63 = vpop.eup %601  ;;  %611 = vpow2.f32 %v193_v62  ;;  %v203_v47 = vmul.f32 1.442695, %v149_v41 }
  0xa9   :  { %v604_v59 = vpop.eup %603  ;;  %v1077_v42 = vpop.xlane.xlu1 %119  ;;  %613 = vpow2.f32 %v195_v53  ;;  %v199_v30 = vmul.f32 1.442695, %v147_v3  ;;  %v201_v58 = vmul.f32 1.442695, %v148_v17 }
  0xaa   :  { %1351 = vst [vmem:[#allocation23_spill] sm:$0xff] %v1077_v42  ;;  %v1079_v48 = vpop.xlane.xlu0 %116  ;;  %v238_v55 = vadd.f32 %v604_v59, %v602_v63  ;;  %615 = vpow2.f32 %v197_v57  ;;  %v205_v63 = vmul.f32 1.442695, %v150_v61  ;;  %v153_v57 = vsub.f32 %v886_v37, %v1077_v42 }
  0xab   :  { %1352 = vst [vmem:[#allocation24_spill] sm:$0xff] %v1079_v48  ;;  %v151_v56 = vsub.f32 %v896_v39, %v1079_v48  ;;  %617 = vpow2.f32 %v199_v30  ;;  %v152_v53 = vsub.f32 %v901_v40, %v1079_v48  ;;  %v154_v30 = vsub.f32 %v891_v38, %v1077_v42 }
  0xac   :  { %v606_v8 = vpop.eup %605  ;;  %239 = vadd.xlane.f32.xlu1 %v238_v55  ;;  %619 = vpow2.f32 %v201_v58  ;;  %v211_v48 = vmul.f32 1.442695, %v153_v57 }
  0xad   :  { %v608_v62 = vpop.eup %607  ;;  %v1087_v54 = vpop.xlane.xlu1 %125  ;;  %621 = vpow2.f32 %v203_v47  ;;  %v207_v3 = vmul.f32 1.442695, %v151_v56  ;;  %v209_v55 = vmul.f32 1.442695, %v152_v53  ;;  %v213_v53 = vmul.f32 1.442695, %v154_v30 }
  0xae   :  { %1353 = vst [vmem:[#allocation25_spill] sm:$0xff] %v1087_v54  ;;  %v244_v59 = vadd.f32 %v608_v62, %v606_v8  ;;  %v1098_v18 = vpop.xlane.xlu0 %122  ;;  %623 = vpow2.f32 %v205_v63 }
  0xaf   :  { %625 = vpow2.f32 %v207_v3  ;;  %v155_v29 = vsub.f32 %v920_v45, %v1098_v18 }
  0xb0   :  { %245 = vadd.xlane.f32.xlu1 %v244_v59  ;;  %627 = vpow2.f32 %v209_v55 }
  0xb1   :  { %v324_v17 = vpop.permute.xlu1 %323  ;;  %v610_v41 = vpop.eup %609  ;;  %629 = vpow2.f32 %v211_v48 }
  0xb2   :  { %vm370_vm0 = vcmp.eq.s32.totalorder %v1081_v35, %v324_v17  ;;  %vm371_vm1 = vcmp.eq.s32.totalorder %v1092_v60, %v324_v17  ;;  %v612_v61 = vpop.eup %611  ;;  %v156_v17 = vsub.f32 %v925_v46, %v1098_v18  ;;  %631 = vpow2.f32 %v213_v53 }
  0xb3   :  { %v402_v58 = vsel %vm370_vm0, %v752_v2, 0.0  ;;  %v403_v47 = vsel %vm371_vm1, %v759_v4, 0.0  ;;  %v614_v8 = vpop.eup %613  ;;  %v247_v56 = vadd.f32 %v612_v61, %v610_v41  ;;  %v127_v61 = vsub.f32 %v752_v2, %v1033_v12 }
  0xb4   :  { %v434_v62 = vadd.f32 %v403_v47, %v402_v58  ;;  %v616_v59 = vpop.eup %615  ;;  %v157_v58 = vsub.f32 %v910_v43, %v1087_v54  ;;  %v217_v48 = vmul.f32 1.442695, %v156_v17 }
  0xb5   :  { %v330_v42 = vpop.permute.xlu1 %329  ;;  %248 = vadd.xlane.f32.xlu1 %v247_v56  ;;  %v618_v57 = vpop.eup %617  ;;  %v250_v3 = vadd.f32 %v616_v59, %v614_v8 }
  0xb6   :  { %v327_v63 = vpop.permute.xlu0 %326  ;;  %435 = vadd.xlane.f32.xlu0 %v434_v62  ;;  %vm374_vm2 = vcmp.eq.s32.totalorder %v1081_v35, %v330_v42  ;;  %vm375_vm3 = vcmp.eq.s32.totalorder %v1092_v60, %v330_v42  ;;  %v620_v55 = vpop.eup %619  ;;  %v158_v62 = vsub.f32 %v915_v44, %v1087_v54 }
  0xb7   :  { %vm372_vm4 = vcmp.eq.s32.totalorder %v1081_v35, %v327_v63  ;;  %vm373_vm5 = vcmp.eq.s32.totalorder %v1092_v60, %v327_v63  ;;  %v215_v63 = vmul.f32 1.442695, %v155_v29  ;;  %v406_v8 = vsel %vm374_vm2, %v742_v0, 0.0  ;;  %v622_v2 = vpop.eup %621 }
  0xb8   :  { %v404_v41 = vsel %vm372_vm4, %v776_v9, 0.0  ;;  %v405_v30 = vsel %vm373_vm5, %v781_v10, 0.0  ;;  %v407_v59 = vsel %vm375_vm3, %v747_v1, 0.0  ;;  %v128_v29 = vsub.f32 %v759_v4, %v1033_v12 }
  0xb9   :  { %v333_v47 = vpop.permute.xlu1 %332  ;;  %v437_v56 = vadd.f32 %v405_v30, %v404_v41  ;;  %251 = vadd.xlane.f32.xlu1 %v250_v3  ;;  %v253_v3 = vadd.f32 %v620_v55, %v618_v57  ;;  %v624_v41 = vpop.eup %623  ;;  %v159_v30 = vmul.f32 1.442695, %v127_v61  ;;  %v129_v0 = vsub.f32 %v776_v9, %v1037_v24 }
  0xba   :  { %vm376_vm6 = vcmp.eq.s32.totalorder %v1081_v35, %v333_v47  ;;  %vm377_vm7 = vcmp.eq.s32.totalorder %v1092_v60, %v333_v47  ;;  %v440_v42 = vadd.f32 %v407_v59, %v406_v8  ;;  %v219_v1 = vmul.f32 1.442695, %v157_v58  ;;  %v626_v47 = vpop.eup %625 }
  0xbb   :  { %438 = vadd.xlane.f32.xlu0 %v437_v56  ;;  %633 = vpow2.f32 %v215_v63  ;;  %v408_v53 = vsel %vm376_vm6, %v764_v5, 0.0  ;;  %v409_v17 = vsel %vm377_vm7, %v769_v6, 0.0  ;;  %v221_v56 = vmul.f32 1.442695, %v158_v62  ;;  %v628_v4 = vpop.eup %627 }
  0xbc   :  { %635 = vpow2.f32 %v217_v48  ;;  %v161_v57 = vmul.f32 1.442695, %v128_v29  ;;  %v130_v9 = vsub.f32 %v781_v10, %v1037_v24  ;;  %v256_v55 = vadd.f32 %v624_v41, %v622_v2 }
  0xbd   :  { %v336_v54 = vpop.permute.xlu1 %335  ;;  %254 = vadd.xlane.f32.xlu1 %v253_v3  ;;  %637 = vpow2.f32 %v159_v30  ;;  %v443_v58 = vadd.f32 %v409_v17, %v408_v53  ;;  %v133_v63 = vsub.f32 %v764_v5, %v1035_v23  ;;  %v163_v59 = vmul.f32 1.442695, %v129_v0 }
  0xbe   :  { %vm378_vm8 = vcmp.eq.s32.totalorder %v1081_v35, %v336_v54  ;;  %vm379_vm9 = vcmp.eq.s32.totalorder %v1092_v60, %v336_v54  ;;  %639 = vpow2.f32 %v219_v1  ;;  %v630_v54 = vpop.eup %629  ;;  %v134_v10 = vsub.f32 %v769_v6, %v1035_v23 }
  0xbf   :  { %441 = vadd.xlane.f32.xlu0 %v440_v42  ;;  %v410_v62 = vsel %vm378_vm8, %v800_v15, 0.0  ;;  %v411_v8 = vsel %vm379_vm9, %v805_v16, 0.0  ;;  %641 = vpow2.f32 %v221_v56  ;;  %v165_v2 = vmul.f32 1.442695, %v130_v9  ;;  %v632_v48 = vpop.eup %631 }
  0xc0   :  { %643 = vpow2.f32 %v161_v57  ;;  %v259_v5 = vadd.f32 %v628_v4, %v626_v47  ;;  %v446_v3 = vadd.f32 %v411_v8, %v410_v62  ;;  %v171_v41 = vmul.f32 1.442695, %v133_v63 }
  0xc1   :  { %v339_v61 = vpop.permute.xlu1 %338  ;;  %257 = vadd.xlane.f32.xlu1 %v256_v55  ;;  %645 = vpow2.f32 %v163_v59  ;;  %v135_v42 = vsub.f32 %v800_v15, %v1045_v36  ;;  %v173_v1 = vmul.f32 1.442695, %v134_v10  ;;  %v136_v53 = vsub.f32 %v805_v16, %v1045_v36 }
  0xc2   :  { %vm380_vm10 = vcmp.eq.s32.totalorder %v1081_v35, %v339_v61  ;;  %vm381_vm11 = vcmp.eq.s32.totalorder %v1092_v60, %v339_v61  ;;  %647 = vpow2.f32 %v165_v2  ;;  %v262_v17 = vadd.f32 %v632_v48, %v630_v54 }
  0xc3   :  { %444 = vadd.xlane.f32.xlu0 %v443_v58  ;;  %v412_v30 = vsel %vm380_vm10, %v790_v13, 0.0  ;;  %v413_v0 = vsel %vm381_vm11, %v795_v14, 0.0  ;;  %649 = vpow2.f32 %v171_v41  ;;  %v175_v57 = vmul.f32 1.442695, %v135_v42 }
  0xc4   :  { %v449_v14 = vadd.f32 %v413_v0, %v412_v30  ;;  %v139_v9 = vsub.f32 %v824_v21, %v1053_v11  ;;  %651 = vpow2.f32 %v173_v1  ;;  %v177_v16 = vmul.f32 1.442695, %v136_v53 }
  0xc5   :  { %v342_v29 = vpop.permute.xlu1 %341  ;;  %260 = vadd.xlane.f32.xlu1 %v259_v5  ;;  %v634_v6 = vpop.eup %633  ;;  %v140_v61 = vsub.f32 %v829_v22, %v1053_v11  ;;  %653 = vpow2.f32 %v175_v57 }
  0xc6   :  { %vm382_vm12 = vcmp.eq.s32.totalorder %v1081_v35, %v342_v29  ;;  %vm383_vm13 = vcmp.eq.s32.totalorder %v1092_v60, %v342_v29  ;;  %v636_v47 = vpop.eup %635  ;;  %v183_v59 = vmul.f32 1.442695, %v139_v9  ;;  %655 = vpow2.f32 %v177_v16 }
  0xc7   :  { %447 = vadd.xlane.f32.xlu0 %v446_v3  ;;  %v414_v56 = vsel %vm382_vm12, %v824_v21, 0.0  ;;  %v415_v15 = vsel %vm383_vm13, %v829_v22, 0.0  ;;  %v638_v4 = vpop.eup %637  ;;  %v265_v58 = vadd.f32 %v636_v47, %v634_v6  ;;  %v185_v10 = vmul.f32 1.442695, %v140_v61 }
  0xc8   :  { %v640_v55 = vpop.eup %639  ;;  %v452_v8 = vadd.f32 %v415_v15, %v414_v56  ;;  %657 = vpow2.f32 %v183_v59 }
  0xc9   :  { %v1154_v13 = vpop.permute.xlu1 %344  ;;  %263 = vadd.xlane.f32.xlu1 %v262_v17  ;;  %v642_v63 = vpop.eup %641  ;;  %659 = vpow2.f32 %v185_v10 }
  0xca   :  { %v644_v54 = vpop.eup %643  ;;  %v268_v21 = vadd.f32 %v642_v63, %v640_v55  ;;  %vm384_vm6 = vcmp.eq.s32.totalorder %v1081_v35, %v1154_v13  ;;  %vm385_vm7 = vcmp.eq.s32.totalorder %v1092_v60, %v1154_v13  ;;  %v354_v55 = vpop.permute.xlu0 %353 }
  0xcb   :  { %450 = vadd.xlane.f32.xlu0 %v449_v14  ;;  %v646_v2 = vpop.eup %645  ;;  %v223_v48 = vadd.f32 %v644_v54, %v638_v4  ;;  %v417_v63 = vsel %vm385_vm7, %v819_v20, 0.0  ;;  %vm390_vm10 = vcmp.eq.s32.totalorder %v1081_v35, %v354_v55  ;;  %vm391_vm11 = vcmp.eq.s32.totalorder %v1092_v60, %v354_v55 }
  0xcc   :  { %v648_v29 = vpop.eup %647  ;;  %v422_v20 = vsel %vm390_vm10, %v872_v33, 0.0  ;;  %v423_v54 = vsel %vm391_vm11, %v877_v34, 0.0 }
  0xcd   :  { %v1162_v62 = vpop.permute.xlu1 %347  ;;  %266 = vadd.xlane.f32.xlu1 %v265_v58  ;;  %v650_v30 = vpop.eup %649  ;;  %v226_v42 = vadd.f32 %v648_v29, %v646_v2  ;;  %v416_v58 = vsel %vm384_vm6, %v814_v19, 0.0  ;;  %v464_v59 = vadd.f32 %v423_v54, %v422_v20 }
  0xce   :  { %v652_v6 = vpop.eup %651  ;;  %vm386_vm8 = vcmp.eq.s32.totalorder %v1081_v35, %v1162_v62  ;;  %vm387_vm9 = vcmp.eq.s32.totalorder %v1092_v60, %v1162_v62  ;;  %v455_v13 = vadd.f32 %v417_v63, %v416_v58 }
  0xcf   :  { %453 = vadd.xlane.f32.xlu0 %v452_v8  ;;  %v360_v8 = vpop.permute.xlu0 %359 }
  0xd0   :  { %vm394_vm12 = vcmp.eq.s32.totalorder %v1081_v35, %v360_v8  ;;  %vm395_vm13 = vcmp.eq.s32.totalorder %v1092_v60, %v360_v8 }
  0xd1   :  { %v351_v5 = vpop.permute.xlu1 %350  ;;  %269 = vadd.xlane.f32.xlu1 %v268_v21 }
  0xd2   :  { %vm388_vm14 = vcmp.eq.s32.totalorder %v1081_v35, %v351_v5  ;;  %vm389_vm15 = vcmp.eq.s32.totalorder %v1092_v60, %v351_v5 }
  0xd3   :  { %224 = vadd.xlane.f32.xlu0 %v223_v48  ;;  %v420_v22 = vsel %vm388_vm14, %v838_v25, 0.0  ;;  %v421_v3 = vsel %vm389_vm15, %v843_v26, 0.0  ;;  %v654_v25 = vpop.eup %653  ;;  %v232_v26 = vadd.f32 %v652_v6, %v650_v30  ;;  %v366_v62 = vpop.permute.xlu0 %365 }
  0xd4   :  { %v461_v41 = vadd.f32 %v421_v3, %v420_v22  ;;  %v656_v14 = vpop.eup %655  ;;  %vm398_vm14 = vcmp.eq.s32.totalorder %v1081_v35, %v366_v62  ;;  %vm399_vm15 = vcmp.eq.s32.totalorder %v1092_v60, %v366_v62 }
  0xd5   :  { %v357_v0 = vpop.permute.xlu1 %356  ;;  %v658_v57 = vpop.eup %657  ;;  %v235_v9 = vadd.f32 %v656_v14, %v654_v25  ;;  %v430_v33 = vsel %vm398_vm14, %v920_v45, 0.0  ;;  %v431_v34 = vsel %vm399_vm15, %v925_v46, 0.0  ;;  %v63_v14 = vld [vmem:[%s1310_s2] sm:$0xff] }
  0xd6   :  { %vm392_vm0 = vcmp.eq.s32.totalorder %v1081_v35, %v357_v0  ;;  %vm393_vm1 = vcmp.eq.s32.totalorder %v1092_v60, %v357_v0  ;;  %462 = vadd.xlane.f32.xlu1 %v461_v41  ;;  %v476_v21 = vadd.f32 %v431_v34, %v430_v33  ;;  %v1354_v33 = vld [vmem:[#allocation17_spill] sm:$0xff] }
  0xd7   :  { %227 = vadd.xlane.f32.xlu0 %v226_v42  ;;  %v424_v1 = vsel %vm392_vm0, %v862_v31, 0.0  ;;  %v425_v53 = vsel %vm393_vm1, %v867_v32, 0.0  ;;  %v660_v32 = vpop.eup %659  ;;  %vm514_vm0 = vcmp.eq.s32.totalorder %v934_v49, 4294967196  ;;  %vm515_vm1 = vcmp.eq.s32.totalorder %v945_v51, 4294967196  ;;  %v65_v49 = vld [vmem:[%s1310_s2 + $0x10] sm:$0xff]  ;;  %v66_v51 = vld [vmem:[%s1310_s2 + $0x18] sm:$0xff] }
  0xd8   :  { %v467_v17 = vadd.f32 %v425_v53, %v424_v1  ;;  %v241_v61 = vadd.f32 %v660_v32, %v658_v57 }
  0xd9   :  { %v363_v47 = vpop.permute.xlu1 %362 }
  0xda   :  { %vm396_vm2 = vcmp.eq.s32.totalorder %v1081_v35, %v363_v47  ;;  %vm397_vm3 = vcmp.eq.s32.totalorder %v1092_v60, %v363_v47  ;;  %468 = vadd.xlane.f32.xlu1 %v467_v17 }
  0xdb   :  { %233 = vadd.xlane.f32.xlu0 %v232_v26  ;;  %v428_v56 = vsel %vm396_vm2, %v886_v37, 0.0  ;;  %v429_v15 = vsel %vm397_vm3, %v891_v38, 0.0  ;;  %vm516_vm2 = vcmp.eq.s32.totalorder %v940_v50, 4294967196  ;;  %vm517_vm3 = vcmp.eq.s32.totalorder %v951_v52, 4294967196  ;;  %v67_v50 = vld [vmem:[%s1310_s2 + $0x20] sm:$0xff]  ;;  %v68_v52 = vld [vmem:[%s1310_s2 + $0x28] sm:$0xff] }
  0xdc   :  { %v473_v4 = vadd.f32 %v429_v15, %v428_v56 }
  0xdd   :  { %v369_v31 = vpop.permute.xlu1 %368 }
  0xde   :  { %vm400_vm4 = vcmp.eq.s32.totalorder %v1081_v35, %v369_v31  ;;  %vm401_vm5 = vcmp.eq.s32.totalorder %v1092_v60, %v369_v31  ;;  %474 = vadd.xlane.f32.xlu1 %v473_v4 }
  0xdf   :  { %236 = vadd.xlane.f32.xlu0 %v235_v9  ;;  %v432_v37 = vsel %vm400_vm4, %v910_v43, 0.0  ;;  %v433_v38 = vsel %vm401_vm5, %v915_v44, 0.0  ;;  %v418_v43 = vsel %vm386_vm8, %v848_v27, 0.0  ;;  %v419_v44 = vsel %vm387_vm9, %v853_v28, 0.0 }
  0xe0   :  { %v479_v16 = vadd.f32 %v433_v38, %v432_v37  ;;  %v458_v19 = vadd.f32 %v419_v44, %v418_v43  ;;  %v426_v27 = vsel %vm394_vm12, %v896_v39, 0.0  ;;  %v427_v28 = vsel %vm395_vm13, %v901_v40, 0.0 }
  0xe1   :  { %v470_v10 = vadd.f32 %v427_v28, %v426_v27 }
  0xe2   :  { %480 = vadd.xlane.f32.xlu1 %v479_v16 }
  0xe3   :  { %242 = vadd.xlane.f32.xlu0 %v241_v61 }
  0xe7   :  { %456 = vadd.xlane.f32.xlu0 %v455_v13 }
  0xeb   :  { %459 = vadd.xlane.f32.xlu0 %v458_v19 }
  0xef   :  { %465 = vadd.xlane.f32.xlu0 %v464_v59 }
  0xf3   :  { %471 = vadd.xlane.f32.xlu0 %v470_v10 }
  0xf7   :  { %477 = vadd.xlane.f32.xlu0 %v476_v21 }
 0x131   :  { %v231_v29 = vpop.xlane.xlu1 %230 }
 0x132   :  { %661 = vlog2.f32 %v231_v29  ;;  %v1355_v29 = vld [vmem:[#allocation6_spill] sm:$0xff] }
 0x133   :  { %vm518_vm4 = vcmp.eq.s32.totalorder %v1355_v29, 4294967196  ;;  %v1367_v29 = vld [vmem:[#allocation24_spill] sm:$0xff] }
 0x139   :  { %v240_v40 = vpop.xlane.xlu1 %239 }
 0x13c   :  { %v662_v42 = vpop.eup %661 }
 0x13d   :  { %v246_v60 = vpop.xlane.xlu1 %245  ;;  %v276_v25 = vmul.f32 0.6931472, %v662_v42 }
 0x13f   :  { %v305_v31 = vadd.f32 %v276_v25, %v1027_v7  ;;  %v1358_v25 = vld [vmem:[#allocation10_spill] sm:$0xff] }
 0x140   :  { %vm520_vm6 = vcmp.eq.s32.totalorder %v1358_v25, 4294967196 }
 0x142   :  { %v249_v45 = vpop.xlane.xlu1 %248 }
 0x143   :  { %v436_v2 = vpop.xlane.xlu0 %435 }
 0x146   :  { %v252_v30 = vpop.xlane.xlu1 %251 }
 0x148   :  { %v439_v5 = vpop.xlane.xlu0 %438 }
 0x14a   :  { %v255_v1 = vpop.xlane.xlu1 %254 }
 0x14c   :  { %v442_v48 = vpop.xlane.xlu0 %441 }
 0x14d   :  { %v484_v38 = vsub.f32 %v305_v31, %v442_v48 }
 0x14e   :  { %v258_v57 = vpop.xlane.xlu1 %257 }
 0x14f   :  { %v500_v8 = vmul.f32 %v484_v38, %v65_v49 }
 0x150   :  { %v1204_v39 = vpop.xlane.xlu0 %444 }
 0x151   :  { %v532_v27 = vsel %vm516_vm2, 0.0, %v500_v8 }
 0x152   :  { %v261_v13 = vpop.xlane.xlu1 %260 }
 0x154   :  { %v1206_v22 = vpop.xlane.xlu0 %447 }
 0x156   :  { %v264_v10 = vpop.xlane.xlu1 %263 }
 0x158   :  { %v1208_v35 = vpop.xlane.xlu0 %450 }
 0x15c   :  { %v1210_v3 = vpop.xlane.xlu0 %453 }
 0x160   :  { %v225_v46 = vpop.xlane.xlu0 %224 }
 0x161   :  { %663 = vlog2.f32 %v225_v46 }
 0x164   :  { %v228_v41 = vpop.xlane.xlu0 %227 }
 0x165   :  { %665 = vlog2.f32 %v228_v41  ;;  %v1356_v41 = vld [vmem:[#allocation8_spill] sm:$0xff] }
 0x166   :  { %vm519_vm5 = vcmp.eq.s32.totalorder %v1356_v41, 4294967196 }
 0x168   :  { %v234_v0 = vpop.xlane.xlu0 %233 }
 0x169   :  { %667 = vlog2.f32 %v234_v0  ;;  %v1357_v0 = vld [vmem:[#allocation18_spill] sm:$0xff] }
 0x16a   :  { %669 = vlog2.f32 %v240_v40 }
 0x16b   :  { %v664_v6 = vpop.eup %663 }
 0x16c   :  { %v272_v53 = vmul.f32 0.6931472, %v664_v6  ;;  %v237_v17 = vpop.xlane.xlu0 %236 }
 0x16d   :  { %671 = vlog2.f32 %v237_v17 }
 0x16e   :  { %v303_v47 = vadd.f32 %v272_v53, %v1033_v12  ;;  %v64_v12 = vld [vmem:[%s1310_s2 + $0x8] sm:$0xff] }
 0x16f   :  { %v666_v26 = vpop.eup %665 }
 0x170   :  { %v274_v56 = vmul.f32 0.6931472, %v666_v26  ;;  %v243_v15 = vpop.xlane.xlu0 %242  ;;  %v482_v4 = vsub.f32 %v303_v47, %v436_v2  ;;  %v70_v47 = vld [vmem:[%s1310_s2 + $0x38] sm:$0xff] }
 0x171   :  { %673 = vlog2.f32 %v243_v15 }
 0x172   :  { %v304_v9 = vadd.f32 %v274_v56, %v1037_v24  ;;  %v498_v32 = vmul.f32 %v482_v4, %v63_v14  ;;  %675 = vlog2.f32 %v246_v60  ;;  %v1359_v56 = vld [vmem:[#allocation20_spill] sm:$0xff] }
 0x173   :  { %v668_v37 = vpop.eup %667  ;;  %677 = vlog2.f32 %v249_v45 }
 0x174   :  { %v483_v55 = vsub.f32 %v304_v9, %v439_v5  ;;  %v278_v16 = vmul.f32 0.6931472, %v668_v37  ;;  %v530_v61 = vsel %vm514_vm0, 0.0, %v498_v32  ;;  %v670_v7 = vpop.eup %669  ;;  %679 = vlog2.f32 %v252_v30  ;;  %v457_v60 = vpop.xlane.xlu0 %456  ;;  %v1360_v32 = vld [vmem:[#allocation11_spill] sm:$0xff] }
 0x175   :  { %546 = vxpose.xlu0.b32.start [1/16] (narrow) %v530_v61, 8  ;;  %v282_v20 = vmul.f32 0.6931472, %v670_v7  ;;  %681 = vlog2.f32 %v255_v1  ;;  %vm521_vm7 = vcmp.eq.s32.totalorder %v1360_v32, 4294967196 }
 0x176   :  { %v306_v24 = vadd.f32 %v278_v16, %v1035_v23  ;;  %v499_v58 = vmul.f32 %v483_v55, %v64_v12  ;;  %683 = vlog2.f32 %v258_v57  ;;  %v71_v12 = vld [vmem:[%s1310_s2 + $0x40] sm:$0xff]  ;;  %v1361_v55 = vld [vmem:[#allocation19_spill] sm:$0xff] }
 0x177   :  { %v672_v63 = vpop.eup %671  ;;  %v308_v34 = vadd.f32 %v282_v20, %v1354_v33  ;;  %685 = vlog2.f32 %v261_v13 }
 0x178   :  { %v485_v43 = vsub.f32 %v306_v24, %v1204_v39  ;;  %v280_v44 = vmul.f32 0.6931472, %v672_v63  ;;  %v531_v19 = vsel %vm515_vm1, 0.0, %v499_v58  ;;  %v460_v26 = vpop.xlane.xlu0 %459  ;;  %687 = vlog2.f32 %v264_v10  ;;  %v1362_v58 = vld [vmem:[#allocation12_spill] sm:$0xff]  ;;  %v72_v63 = vld [vmem:[%s1310_s2 + $0x48] sm:$0xff] }
 0x179   :  { %547 = vxpose.xlu0.b32.cont [2/16] (narrow) %v531_v19, 8  ;;  %vm522_vm8 = vcmp.eq.s32.totalorder %v1362_v58, 4294967196 }
 0x17a   :  { %v307_v54 = vadd.f32 %v280_v44, %v1045_v36  ;;  %v501_v28 = vmul.f32 %v485_v43, %v66_v51  ;;  %v487_v36 = vsub.f32 %v308_v34, %v1208_v35  ;;  %v1363_v43 = vld [vmem:[#allocation22_spill] sm:$0xff] }
 0x17b   :  { %v674_v23 = vpop.eup %673 }
 0x17c   :  { %v486_v62 = vsub.f32 %v307_v54, %v1206_v22  ;;  %v284_v59 = vmul.f32 0.6931472, %v674_v23  ;;  %v676_v21 = vpop.eup %675  ;;  %v533_v5 = vsel %vm517_vm3, 0.0, %v501_v28  ;;  %v267_v22 = vpop.xlane.xlu1 %266  ;;  %v503_v45 = vmul.f32 %v487_v36, %v68_v52  ;;  %v1364_v23 = vld [vmem:[#allocation13_spill] sm:$0xff] }
 0x17d   :  { %548 = vxpose.xlu0.b32.cont [3/16] (narrow) %v532_v27, 8  ;;  %v286_v39 = vmul.f32 0.6931472, %v676_v21  ;;  %v678_v40 = vpop.eup %677  ;;  %689 = vlog2.f32 %v267_v22  ;;  %v466_v13 = vpop.xlane.xlu0 %465  ;;  %vm523_vm9 = vcmp.eq.s32.totalorder %v1364_v23, 4294967196  ;;  %v1365_v28 = vld [vmem:[#allocation21_spill] sm:$0xff] }
 0x17e   :  { %v309_v2 = vadd.f32 %v284_v59, %v1053_v11  ;;  %v502_v48 = vmul.f32 %v486_v62, %v67_v50  ;;  %v69_v11 = vld [vmem:[%s1310_s2 + $0x30] sm:$0xff]  ;;  %v288_v30 = vmul.f32 0.6931472, %v678_v40  ;;  %v680_v6 = vpop.eup %679  ;;  %v535_v53 = vsel %vm519_vm5, 0.0, %v503_v45  ;;  %v1366_v36 = vld [vmem:[#allocation5_spill] sm:$0xff] }
 0x17f   :  { %v310_v42 = vadd.f32 %v286_v39, %v1357_v0  ;;  %v290_v14 = vmul.f32 0.6931472, %v680_v6  ;;  %v682_v4 = vpop.eup %681  ;;  %v73_v59 = vld [vmem:[%s1310_s2 + $0x50] sm:$0xff]  ;;  %vm524_vm10 = vcmp.eq.s32.totalorder %v1366_v36, 4294967196 }
 0x180   :  { %v488_v46 = vsub.f32 %v309_v2, %v1210_v3  ;;  %v534_v35 = vsel %vm518_vm4, 0.0, %v502_v48  ;;  %v270_v3 = vpop.xlane.xlu1 %269  ;;  %v311_v15 = vadd.f32 %v288_v30, %v1359_v56  ;;  %v292_v38 = vmul.f32 0.6931472, %v682_v4  ;;  %v684_v61 = vpop.eup %683  ;;  %v74_v2 = vld [vmem:[%s1310_s2 + $0x58] sm:$0xff]  ;;  %v1368_v45 = vld [vmem:[#allocation14_spill] sm:$0xff] }
 0x181   :  { %549 = vxpose.xlu0.b32.cont [4/16] (narrow) %v533_v5, 8  ;;  %v489_v1 = vsub.f32 %v310_v42, %v457_v60  ;;  %v312_v16 = vadd.f32 %v290_v14, %v1361_v55  ;;  %v294_v8 = vmul.f32 0.6931472, %v684_v61  ;;  %v686_v19 = vpop.eup %685  ;;  %691 = vlog2.f32 %v270_v3  ;;  %v472_v5 = vpop.xlane.xlu0 %471  ;;  %v1374_v61 = vld [vmem:[#allocation16_spill] sm:$0xff] }
 0x182   :  { %v504_v17 = vmul.f32 %v488_v46, %v69_v11  ;;  %v490_v31 = vsub.f32 %v311_v15, %v460_v26  ;;  %v313_v44 = vadd.f32 %v292_v38, %v1363_v43  ;;  %v296_v27 = vmul.f32 0.6931472, %v686_v19  ;;  %v688_v50 = vpop.eup %687  ;;  %v1369_v11 = vld [vmem:[#allocation23_spill] sm:$0xff]  ;;  %v1373_v38 = vld [vmem:[#allocation9_spill] sm:$0xff] }
 0x183   :  { %v505_v57 = vmul.f32 %v489_v1, %v70_v47  ;;  %v314_v10 = vadd.f32 %v294_v8, %v1365_v28  ;;  %v298_v48 = vmul.f32 0.6931472, %v688_v50  ;;  %vm525_vm11 = vcmp.eq.s32.totalorder %v1368_v45, 4294967196  ;;  %v1371_v15 = vld [vmem:[#allocation15_spill] sm:$0xff] }
 0x184   :  { %v536_v9 = vsel %vm520_vm6, 0.0, %v504_v17  ;;  %v463_v37 = vpop.xlane.xlu1 %462  ;;  %v506_v7 = vmul.f32 %v490_v31, %v71_v12  ;;  %v492_v20 = vsub.f32 %v313_v44, %v466_v13  ;;  %v315_v52 = vadd.f32 %v296_v27, %v1367_v29  ;;  %v76_v17 = vld [vmem:[%s1310_s2 + $0x68] sm:$0xff] }
 0x185   :  { %550 = vxpose.xlu0.b32.cont [5/16] (narrow) %v534_v35, 8  ;;  %v491_v49 = vsub.f32 %v312_v16, %v463_v37  ;;  %v537_v24 = vsel %vm521_vm7, 0.0, %v505_v57  ;;  %v75_v35 = vld [vmem:[%s1310_s2 + $0x60] sm:$0xff]  ;;  %v316_v30 = vadd.f32 %v298_v48, %v1369_v11  ;;  %v478_v25 = vpop.xlane.xlu0 %477  ;;  %vm527_vm13 = vcmp.eq.s32.totalorder %v1371_v15, 4294967196  ;;  %v77_v57 = vld [vmem:[%s1310_s2 + $0x70] sm:$0xff] }
 0x186   :  { %v538_v54 = vsel %vm522_vm8, 0.0, %v506_v7  ;;  %v508_v34 = vmul.f32 %v492_v20, %v73_v59  ;;  %v494_v22 = vsub.f32 %v315_v52, %v472_v5  ;;  %v1372_v31 = vld [vmem:[#allocation25_spill] sm:$0xff]  ;;  %vm528_vm14 = vcmp.eq.s32.totalorder %v1373_v38, 4294967196 }
 0x187   :  { %v507_v51 = vmul.f32 %v491_v49, %v72_v63  ;;  %v690_v39 = vpop.eup %689  ;;  %vm529_vm15 = vcmp.eq.s32.totalorder %v1374_v61, 4294967196 }
 0x188   :  { %v469_v62 = vpop.xlane.xlu1 %468  ;;  %v540_v60 = vsel %vm524_vm10, 0.0, %v508_v34  ;;  %v300_v41 = vmul.f32 0.6931472, %v690_v39  ;;  %v510_v6 = vmul.f32 %v494_v22, %v75_v35 }
 0x189   :  { %551 = vxpose.xlu0.b32.cont [6/16] (narrow) %v535_v53, 8  ;;  %v493_v33 = vsub.f32 %v314_v10, %v469_v62  ;;  %v539_v21 = vsel %vm523_vm9, 0.0, %v507_v51  ;;  %v1370_v53 = vld [vmem:[#allocation7_spill] sm:$0xff] }
 0x18a   :  { %vm526_vm12 = vcmp.eq.s32.totalorder %v1370_v53, 4294967196  ;;  %v317_v47 = vadd.f32 %v300_v41, %v1098_v18  ;;  %v78_v18 = vld [vmem:[%s1310_s2 + $0x78] sm:$0xff] }
 0x18b   :  { %v509_v40 = vmul.f32 %v493_v33, %v74_v2  ;;  %v692_v0 = vpop.eup %691  ;;  %v542_v56 = vsel %vm526_vm12, 0.0, %v510_v6 }
 0x18c   :  { %v475_v46 = vpop.xlane.xlu1 %474  ;;  %v302_v3 = vmul.f32 0.6931472, %v692_v0  ;;  %v496_v14 = vsub.f32 %v317_v47, %v478_v25 }
 0x18d   :  { %552 = vxpose.xlu0.b32.cont [7/16] (narrow) %v536_v9, 8  ;;  %v495_v42 = vsub.f32 %v316_v30, %v475_v46  ;;  %v541_v1 = vsel %vm525_vm11, 0.0, %v509_v40 }
 0x18e   :  { %v318_v9 = vadd.f32 %v302_v3, %v1372_v31  ;;  %v512_v37 = vmul.f32 %v496_v14, %v77_v57 }
 0x18f   :  { %v511_v26 = vmul.f32 %v495_v42, %v76_v17 }
 0x190   :  { %v481_v4 = vpop.xlane.xlu1 %480  ;;  %v544_v16 = vsel %vm528_vm14, 0.0, %v512_v37 }
 0x191   :  { %553 = vxpose.xlu0.b32.cont [8/16] (narrow) %v537_v24, 8  ;;  %v497_v32 = vsub.f32 %v318_v9, %v481_v4  ;;  %v543_v12 = vsel %vm527_vm13, 0.0, %v511_v26 }
 0x193   :  { %v513_v55 = vmul.f32 %v497_v32, %v78_v18 }
 0x195   :  { %554 = vxpose.xlu0.b32.cont [9/16] (narrow) %v538_v54, 8  ;;  %v545_v49 = vsel %vm529_vm15, 0.0, %v513_v55 }
 0x199   :  { %555 = vxpose.xlu0.b32.cont [10/16] (narrow) %v539_v21, 8 }
 0x19d   :  { %556 = vxpose.xlu0.b32.cont [11/16] (narrow) %v540_v60, 8 }
 0x1a1   :  { %557 = vxpose.xlu0.b32.cont [12/16] (narrow) %v541_v1, 8 }
 0x1a5   :  { %558 = vxpose.xlu0.b32.cont [13/16] (narrow) %v542_v56, 8 }
 0x1a9   :  { %559 = vxpose.xlu0.b32.cont [14/16] (narrow) %v543_v12, 8 }
 0x1ad   :  { %560 = vxpose.xlu0.b32.cont [15/16] (narrow) %v544_v16, 8 }
 0x1b1   :  { %561 = vxpose.xlu0.b32.end [16/16] (narrow) %v545_v49, 8 }
 0x1f5   :  { %v562_v7 = vpop.trf.xlu0 }
 0x1f6   :  { %578 = vst [vmem:[#allocation2] sm:$0x1] %v562_v7 }
 0x1f7   :  { %704 = shalt.err (!%p701_p4)
}
 0x1f8   :  { %s705_s5 = scalar_lea.hbm %s1311_s3, 16 }
 0x1f9   :  { %p706_p5 = scmp.ne.s32.totalorder %s1311_s3, %s705_s5  ;;  %p709_p6 = scmp.lt.u32.totalorder %s705_s5, %s1311_s3 }
 0x1fb   :  { %p711_p7 = pnand %p709_p6, %p706_p5 }
 0x1fd   :  { %714 = shalt.err (!%p711_p7)
}
 0x1fe   :  { %588 = dma.vmem_to_hbm [thread:$0]  %s586_s28, 16, %s1311_s3, [#allocation3]  }
 0x1ff   :  { %715 = dma.done.wait [#allocation3], 16  }
 0x200   :  { %716 = vsyncadd [#allocation3], 4294967280 }
 0x201   :  { %592 = vsyncpa [#allocation3], 1 }

</bundles_post_ra>
